<compile_context>
chip_gen: v6e
topology: v6e:2x2x1
jax: 0.10.0
libtpu: 0.0.40
codegen_flags: <defaults>
</compile_context>

<pallas_src>
from functools import partial

import jax
import jax.numpy as jnp
from jax import lax
from jax.experimental import pallas as pl
from jax.experimental.pallas import tpu as pltpu

LANES = 128                     # lane width
SUBLANES = 8                    # f32 sublanes per vreg
ALIGN_ELEMS = 2 * SUBLANES * LANES   # 2048: aligned prefix is a multiple of 16 rows
CHUNK_ROWS = 512                # per-chunk working set ~3 x 256 KiB (f32)


def _multiloss_kernel(pred_ref, gt_ref, out_ref, acc_ref, *,
                      rows_valid, block_rows, blocks_per_core,
                      chunk_rows, need_mask):
    """Accumulate per-core partial sums of |pred-gt| and (pred-gt)^2.

    pred_ref/gt_ref : VMEM (block_rows, LANES) tiles (native dtype)
    out_ref         : VMEM (1, 2, 8, LANES) per-core partials [|d| sums, d^2 sums]
    acc_ref         : VMEM (2, 8, LANES) f32 running accumulator (per core)
    """
    c = pl.program_id(0)
    i = pl.program_id(1)

    @pl.when(i == 0)
    def _init():
        acc_ref[...] = jnp.zeros_like(acc_ref)

    g = c * blocks_per_core + i          # unclamped global block index
    row_start = g * block_rows

    n_full = block_rows // chunk_rows
    rem = block_rows - n_full * chunk_rows     # multiple of 16 (or 0)

    def chunk_sums(r0, nrows, masked):
        # Load a (nrows, 128) slab, form the diff, reduce to one (8,128) vreg
        # partial with pure VPU adds (layout-preserving reshape, no XLU).
        p = pred_ref[pl.ds(r0, nrows), :].astype(jnp.float32)
        q = gt_ref[pl.ds(r0, nrows), :].astype(jnp.float32)
        d = p - q
        if masked:
            # Zero rows past the valid range (ragged last block / dummy megacore
            # block whose DMA source was clamped by the index_map).
            rid = row_start + r0 + lax.broadcasted_iota(jnp.int32, (nrows, 1), 0)
            d = jnp.where(rid < rows_valid, d, 0.0)
        grp = nrows // SUBLANES
        s1 = jnp.sum(jnp.abs(d).reshape(grp, SUBLANES, LANES), axis=0)
        s2 = jnp.sum((d * d).reshape(grp, SUBLANES, LANES), axis=0)
        return s1, s2

    def block_sums(masked):
        l1 = jnp.zeros((SUBLANES, LANES), jnp.float32)
        sq = jnp.zeros((SUBLANES, LANES), jnp.float32)
        if n_full == 1:
            s1, s2 = chunk_sums(0, chunk_rows, masked)
            l1, sq = l1 + s1, sq + s2
        elif n_full > 1:
            def body(j, carry):
                a1, a2 = carry
                r0 = pl.multiple_of(j * chunk_rows, chunk_rows)
                s1, s2 = chunk_sums(r0, chunk_rows, masked)
                return a1 + s1, a2 + s2
            l1, sq = lax.fori_loop(0, n_full, body, (l1, sq), unroll=True)
        if rem > 0:
            s1, s2 = chunk_sums(n_full * chunk_rows, rem, masked)
            l1, sq = l1 + s1, sq + s2
        return l1, sq

    def accumulate(masked):
        l1, sq = block_sums(masked)
        acc_ref[0] = acc_ref[0] + l1
        acc_ref[1] = acc_ref[1] + sq

    if need_mask:
        # Only boundary / dummy blocks pay for the mask; interior blocks take
        # the unmasked fast path.
        is_boundary = (row_start + block_rows) > rows_valid

        @pl.when(jnp.logical_not(is_boundary))
        def _interior():
            accumulate(False)

        @pl.when(is_boundary)
        def _boundary():
            accumulate(True)
    else:
        accumulate(False)

    @pl.when(i == pl.num_programs(1) - 1)
    def _finalize():
        out_ref[0] = acc_ref[...]


def _chip_layout():
    """Pick (ncores, block_bytes_per_input_per_buffer) for the local TPU.

    Conservative default (v5e/v6e: single TensorCore, modest scoped VMEM);
    v7x gets a 2-way core split and bigger blocks.
    """
    ncores = 1
    block_bytes = 2 << 20          # 2 MiB -> 8 MiB double-buffered inputs total
    kind = ""
    try:
        kind = jax.devices()[0].device_kind.lower()
    except Exception:
        pass
    if "v7" in kind:
        ncores = 2                 # shard the streaming reduction across both TCs
        block_bytes = 4 << 20      # 16 MiB of buffers, under 32 MiB scoped VMEM
    return ncores, block_bytes


def multi_loss_forward(pred, gt, alpha1=1.0, alpha2=0.1):
    """Equivalent of (alpha1*L1Loss() + alpha2*MSELoss())(pred, gt).

    Returns (combined_loss, details) matching MultiLoss.forward semantics:
    details hold the *unscaled* individual loss values.
    """
    assert pred.shape == gt.shape
    n = int(pred.size)
    assert n > 0

    flat_p = pred.reshape(-1)      # native dtype; pure metadata reshape
    flat_g = gt.reshape(-1)

    itemsize = jnp.dtype(pred.dtype).itemsize
    n_main = (n // ALIGN_ELEMS) * ALIGN_ELEMS
    rows_main = n_main // LANES            # multiple of 16

    l1_sum = jnp.float32(0.0)
    sq_sum = jnp.float32(0.0)

    if rows_main > 0:
        if n_main == n:
            p2 = flat_p.reshape(rows_main, LANES)    # zero-copy reshape
            g2 = flat_g.reshape(rows_main, LANES)
        else:
            p2 = lax.slice(flat_p, (0,), (n_main,)).reshape(rows_main, LANES)
            g2 = lax.slice(flat_g, (0,), (n_main,)).reshape(rows_main, LANES)

        ncores, block_bytes = _chip_layout()
        target_rows = max(2 * SUBLANES, block_bytes // (LANES * itemsize))
        block_rows = min(int(target_rows), rows_main)      # multiple of 16
        chunk_rows = min(CHUNK_ROWS, block_rows)

        num_blocks = pl.cdiv(rows_main, block_rows)
        blocks_per_core = pl.cdiv(num_blocks, ncores)
        need_mask = (rows_main % block_rows != 0) or (num_blocks % ncores != 0)

        def in_map(c, i):
            g = c * blocks_per_core + i
            # Clamp so the DMA never goes out of bounds; any wasted/dummy step's
            # contribution is masked to zero inside the kernel.
            return (jnp.minimum(g, num_blocks - 1), 0)

        if ncores > 1:
            dims = (getattr(pltpu, "CORE_PARALLEL", "parallel"),
                    getattr(pltpu, "ARBITRARY", "arbitrary"))
        else:
            dims = ("arbitrary", "arbitrary")

        cost = pl.CostEstimate(
            flops=5 * n_main,
            transcendentals=0,
            bytes_accessed=2 * n_main * itemsize
                           + ncores * 2 * SUBLANES * LANES * 4,
        )

        parts = pl.pallas_call(
            partial(_multiloss_kernel,
                    rows_valid=rows_main,
                    block_rows=block_rows,
                    blocks_per_core=blocks_per_core,
                    chunk_rows=chunk_rows,
                    need_mask=need_mask),
            out_shape=jax.ShapeDtypeStruct((ncores, 2, SUBLANES, LANES), jnp.float32),
            grid=(ncores, blocks_per_core),
            in_specs=[
                pl.BlockSpec((block_rows, LANES), in_map),   # pred tile
                pl.BlockSpec((block_rows, LANES), in_map),   # gt tile
            ],
            out_specs=pl.BlockSpec((1, 2, SUBLANES, LANES),
                                   lambda c, i: (c, 0, 0, 0)),
            scratch_shapes=[pltpu.VMEM((2, SUBLANES, LANES), jnp.float32)],
            compiler_params=pltpu.CompilerParams(dimension_semantics=dims),
            cost_estimate=cost,
        )(p2, g2)

        l1_sum = jnp.sum(parts[:, 0])
        sq_sum = jnp.sum(parts[:, 1])

    if n_main < n:
        # Unaligned tail (< 2048 elements): plain JAX, avoids ever materialising
        # a padded copy of the full tensors in HBM.
        dt = flat_p[n_main:].astype(jnp.float32) - flat_g[n_main:].astype(jnp.float32)
        l1_sum = l1_sum + jnp.sum(jnp.abs(dt))
        sq_sum = sq_sum + jnp.sum(dt * dt)

    inv_n = jnp.float32(1.0 / n)
    l1 = l1_sum * inv_n
    mse = sq_sum * inv_n
    # MultiLoss.forward: loss = alpha1 * loss1 + alpha2 * loss2
    combined = alpha1 * l1 + alpha2 * mse
    details = {"L1Loss": l1, "MSELoss": mse}   # unscaled per-loss values
    return combined, details


def _reference(pred, gt, alpha1, alpha2):
    d = pred.astype(jnp.float32) - gt.astype(jnp.float32)
    l1 = jnp.mean(jnp.abs(d))
    mse = jnp.mean(d * d)
    return alpha1 * l1 + alpha2 * mse, l1, mse


if __name__ == "__main__":
    key = jax.random.PRNGKey(0)
    k1, k2, k3, k4 = jax.random.split(key, 4)

    ok = True

    # 1) NCHW inputs, as a dust3r regression loss would see (pred, gt).
    pred = jax.random.normal(k1, (2, 4, 16, 16), dtype=jnp.float32)
    gt = jax.random.normal(k2, (2, 4, 16, 16), dtype=jnp.float32)
    loss, details = multi_loss_forward(pred, gt, alpha1=1.0, alpha2=0.1)
    loss = jax.block_until_ready(loss)
    ref_c, ref_l1, ref_mse = _reference(pred, gt, 1.0, 0.1)
    ok &= bool(jnp.allclose(loss, ref_c, rtol=1e-5, atol=1e-5))
    ok &= bool(jnp.allclose(details["L1Loss"], ref_l1, rtol=1e-5, atol=1e-5))
    ok &= bool(jnp.allclose(details["MSELoss"], ref_mse, rtol=1e-5, atol=1e-5))

    # 2) Non-aligned size: exercises kernel prefix + JAX tail.
    pred2 = jax.random.normal(k3, (2, 3, 40, 40), dtype=jnp.float32)
    gt2 = jax.random.normal(k4, (2, 3, 40, 40), dtype=jnp.float32)
    loss2, details2 = multi_loss_forward(pred2, gt2, alpha1=1.0, alpha2=0.1)
    loss2 = jax.block_until_ready(loss2)
    ref_c2, ref_l12, ref_mse2 = _reference(pred2, gt2, 1.0, 0.1)
    ok &= bool(jnp.allclose(loss2, ref_c2, rtol=1e-5, atol=1e-5))
    ok &= bool(jnp.allclose(details2["L1Loss"], ref_l12, rtol=1e-5, atol=1e-5))
    ok &= bool(jnp.allclose(details2["MSELoss"], ref_mse2, rtol=1e-5, atol=1e-5))

    assert ok
    print("KERNEL_OK")
</pallas_src>

<mosaic_0001>
module attributes {stable_mosaic.version = 11 : i64} {
  func.func @_multiloss_kernel(%arg0: i32, %arg1: i32, %arg2: memref<16x128xf32, #tpu.memory_space<vmem>>, %arg3: memref<16x128xf32, #tpu.memory_space<vmem>>, %arg4: memref<1x2x8x128xf32, #tpu.memory_space<vmem>>, %arg5: memref<2x8x128xf32, #tpu.memory_space<vmem>>) attributes {dimension_semantics = [#tpu.dimension_semantics<arbitrary>, #tpu.dimension_semantics<arbitrary>], iteration_bounds = array<i64: 1, 1>, scalar_prefetch = 0 : i64, scratch_operands = 1 : i64, tpu.core_type = #tpu.core_type<tc>, window_params = [{transform_indices = @transform_0, window_bounds = array<i64: 16, 128>}, {transform_indices = @transform_1, window_bounds = array<i64: 16, 128>}, {transform_indices = @transform_2, window_bounds = array<i64: 1, 2, 8, 128>}]} {
    %c0_i32 = arith.constant 0 : i32
    %0 = arith.cmpi eq, %arg1, %c0_i32 : i32
    %1 = arith.extui %0 : i1 to i32
    %c0_i32_0 = arith.constant 0 : i32
    %2 = arith.cmpi ne, %1, %c0_i32_0 : i32
    scf.if %2 {
      %cst_20 = arith.constant 0.000000e+00 : f32
      %31 = vector.broadcast %cst_20 : f32 to vector<2x8x128xf32>
      %c0_21 = arith.constant 0 : index
      %c0_22 = arith.constant 0 : index
      %c0_23 = arith.constant 0 : index
      %32 = vector.load %arg5[%c0_21, %c0_22, %c0_23] : memref<2x8x128xf32, #tpu.memory_space<vmem>>, vector<2x8x128xf32>
      tpu.vector_store %arg5[%c0_21, %c0_22, %c0_23], %31 {strides = array<i32>} : memref<2x8x128xf32, #tpu.memory_space<vmem>>, vector<2x8x128xf32>,
    } else {
    }
    %cst = arith.constant 0.000000e+00 : f32
    %3 = vector.broadcast %cst : f32 to vector<8x128xf32>
    %cst_1 = arith.constant 0.000000e+00 : f32
    %4 = vector.broadcast %cst_1 : f32 to vector<8x128xf32>
    %c0 = arith.constant 0 : index
    %c0_2 = arith.constant 0 : index
    %5 = vector.load %arg2[%c0, %c0_2] : memref<16x128xf32, #tpu.memory_space<vmem>>, vector<16x128xf32>
    %c0_3 = arith.constant 0 : index
    %c0_4 = arith.constant 0 : index
    %6 = vector.load %arg3[%c0_3, %c0_4] : memref<16x128xf32, #tpu.memory_space<vmem>>, vector<16x128xf32>
    %7 = arith.subf %5, %6 : vector<16x128xf32>
    %8 = math.absf %7 : vector<16x128xf32>
    %9 = vector.shape_cast %8 : vector<16x128xf32> to vector<2x8x128xf32>
    %cst_5 = arith.constant dense<0.000000e+00> : vector<8x128xf32>
    %10 = vector.multi_reduction <add>, %9, %cst_5 [0] : vector<2x8x128xf32> to vector<8x128xf32>
    %11 = arith.mulf %7, %7 : vector<16x128xf32>
    %12 = vector.shape_cast %11 : vector<16x128xf32> to vector<2x8x128xf32>
    %cst_6 = arith.constant dense<0.000000e+00> : vector<8x128xf32>
    %13 = vector.multi_reduction <add>, %12, %cst_6 [0] : vector<2x8x128xf32> to vector<8x128xf32>
    %14 = arith.addf %3, %10 : vector<8x128xf32>
    %15 = arith.addf %4, %13 : vector<8x128xf32>
    %c0_7 = arith.constant 0 : index
    %c0_8 = arith.constant 0 : index
    %c0_9 = arith.constant 0 : index
    %16 = vector.load %arg5[%c0_7, %c0_8, %c0_9] : memref<2x8x128xf32, #tpu.memory_space<vmem>>, vector<1x8x128xf32>
    %17 = vector.shape_cast %16 : vector<1x8x128xf32> to vector<8x128xf32>
    %18 = arith.addf %17, %14 : vector<8x128xf32>
    %c0_10 = arith.constant 0 : index
    %c0_11 = arith.constant 0 : index
    %c0_12 = arith.constant 0 : index
    %19 = vector.load %arg5[%c0_10, %c0_11, %c0_12] : memref<2x8x128xf32, #tpu.memory_space<vmem>>, vector<1x8x128xf32>
    %20 = vector.shape_cast %19 : vector<1x8x128xf32> to vector<8x128xf32>
    %21 = vector.shape_cast %18 : vector<8x128xf32> to vector<1x8x128xf32>
    tpu.vector_store %arg5[%c0_10, %c0_11, %c0_12], %21 {strides = array<i32>} : memref<2x8x128xf32, #tpu.memory_space<vmem>>, vector<1x8x128xf32>,
    %c1 = arith.constant 1 : index
    %c0_13 = arith.constant 0 : index
    %c0_14 = arith.constant 0 : index
    %22 = vector.load %arg5[%c1, %c0_13, %c0_14] : memref<2x8x128xf32, #tpu.memory_space<vmem>>, vector<1x8x128xf32>
    %23 = vector.shape_cast %22 : vector<1x8x128xf32> to vector<8x128xf32>
    %24 = arith.addf %23, %15 : vector<8x128xf32>
    %c1_15 = arith.constant 1 : index
    %c0_16 = arith.constant 0 : index
    %c0_17 = arith.constant 0 : index
    %25 = vector.load %arg5[%c1_15, %c0_16, %c0_17] : memref<2x8x128xf32, #tpu.memory_space<vmem>>, vector<1x8x128xf32>
    %26 = vector.shape_cast %25 : vector<1x8x128xf32> to vector<8x128xf32>
    %27 = vector.shape_cast %24 : vector<8x128xf32> to vector<1x8x128xf32>
    tpu.vector_store %arg5[%c1_15, %c0_16, %c0_17], %27 {strides = array<i32>} : memref<2x8x128xf32, #tpu.memory_space<vmem>>, vector<1x8x128xf32>,
    %c0_i32_18 = arith.constant 0 : i32
    %28 = arith.cmpi eq, %arg1, %c0_i32_18 : i32
    %29 = arith.extui %28 : i1 to i32
    %c0_i32_19 = arith.constant 0 : i32
    %30 = arith.cmpi ne, %29, %c0_i32_19 : i32
    scf.if %30 {
      %c0_20 = arith.constant 0 : index
      %c0_21 = arith.constant 0 : index
      %c0_22 = arith.constant 0 : index
      %31 = vector.load %arg5[%c0_20, %c0_21, %c0_22] : memref<2x8x128xf32, #tpu.memory_space<vmem>>, vector<2x8x128xf32>
      %c0_23 = arith.constant 0 : index
      %c0_24 = arith.constant 0 : index
      %c0_25 = arith.constant 0 : index
      %c0_26 = arith.constant 0 : index
      %32 = vector.load %arg4[%c0_23, %c0_24, %c0_25, %c0_26] : memref<1x2x8x128xf32, #tpu.memory_space<vmem>>, vector<1x2x8x128xf32>
      %33 = vector.shape_cast %32 : vector<1x2x8x128xf32> to vector<2x8x128xf32>
      %34 = vector.shape_cast %31 : vector<2x8x128xf32> to vector<1x2x8x128xf32>
      tpu.vector_store %arg4[%c0_23, %c0_24, %c0_25, %c0_26], %34 {strides = array<i32>} : memref<1x2x8x128xf32, #tpu.memory_space<vmem>>, vector<1x2x8x128xf32>,
    } else {
    }
    return
  }
  func.func @transform_0(%arg0: i32, %arg1: i32) -> (i32, i32) {
    %c1_i32 = arith.constant 1 : i32
    %0 = arith.muli %arg0, %c1_i32 : i32
    %1 = arith.addi %0, %arg1 : i32
    %c0_i32 = arith.constant 0 : i32
    %2 = arith.minsi %1, %c0_i32 : i32
    %c0_i32_0 = arith.constant 0 : i32
    %c0_i32_1 = arith.constant 0 : i32
    return %2, %c0_i32_0 : i32, i32
  }
  func.func @transform_1(%arg0: i32, %arg1: i32) -> (i32, i32) {
    %c1_i32 = arith.constant 1 : i32
    %0 = arith.muli %arg0, %c1_i32 : i32
    %1 = arith.addi %0, %arg1 : i32
    %c0_i32 = arith.constant 0 : i32
    %2 = arith.minsi %1, %c0_i32 : i32
    %c0_i32_0 = arith.constant 0 : i32
    %c0_i32_1 = arith.constant 0 : i32
    return %2, %c0_i32_0 : i32, i32
  }
  func.func @transform_2(%arg0: i32, %arg1: i32) -> (i32, i32, i32, i32) {
    %c0_i32 = arith.constant 0 : i32
    %c0_i32_0 = arith.constant 0 : i32
    %c0_i32_1 = arith.constant 0 : i32
    %c0_i32_2 = arith.constant 0 : i32
    return %arg0, %c0_i32, %c0_i32_0, %c0_i32_1 : i32, i32, i32, i32
  }
}

</mosaic_0001>

<bundles_post_ra>
// kernel: tpu_custom_call.1
= control target key start
LH: loop header
LB: loop body
LE: loop exit
PB: predicated region body
PF: predicated region fallthrough
CT: control target
= control target key end

     0   :  { %7 = vsyncpa [#allocation4], 0  ;;  %s225_s0 = inlined_call_operand.hbm [shape: f32[16,128], index: 0, kind: input, shape index: {}]   ;;  %s226_s1 = inlined_call_operand.hbm [shape: f32[16,128], index: 1, kind: input, shape index: {}]   ;;  %s227_s2 = inlined_call_operand.hbm [shape: f32[1,2,8,128], index: 2, kind: output, shape index: {}]  }
   0x1   :  { %8 = vsyncpa [#allocation7], 0 }
   0x2   :  { %9 = vsyncpa [#allocation5], 0  ;;  %s187_s9 = smov [#allocation3]  }
   0x3   :  { %s21_s10 = sshll.u32 %s187_s9, 4  ;;  %s22_s10 = int_to_ptr.vmem [resolvable:$true] %s21_s10 }
   0x4   :  { %s129_s11 = scalar_lea.vmem %s22_s10, 256  ;;  %p134_p1 = scmp.lt.s32.totalorder %s22_s10, %s22_s10 }
   0x5   :  { %p130_p0 = scmp.ne.s32.totalorder %s22_s10, %s129_s11  ;;  %p135_p2 = scmp.lt.s32.totalorder %s129_s11, %s129_s11 }
   0x7   :  { %p136_p3 = por %p135_p2, %p134_p1 }
   0x9   :  { %p137_p4 = pnand %p136_p3, %p130_p0 }
   0xb   :  { %140 = shalt.err (!%p137_p4)
}
   0xc   :  { %s188_s12 = smov 128   ;;  %s189_s13 = smov 8  }
   0xd   :  { %27 = dma.hbm_to_vmem [thread:$0]  %s225_s0, 256, %s22_s10, [#allocation4], %s188_s12, %s188_s12, %s189_s13  }
   0xe   :  { %s190_s16 = smov [#allocation6]  }
   0xf   :  { %s39_s17 = sshll.u32 %s190_s16, 4  ;;  %s40_s17 = int_to_ptr.vmem [resolvable:$true] %s39_s17 }
  0x10   :  { %s149_s18 = scalar_lea.vmem %s40_s17, 256  ;;  %p154_p6 = scmp.lt.s32.totalorder %s40_s17, %s40_s17 }
  0x11   :  { %p150_p5 = scmp.ne.s32.totalorder %s40_s17, %s149_s18  ;;  %p155_p7 = scmp.lt.s32.totalorder %s149_s18, %s149_s18 }
  0x13   :  { %p156_p8 = por %p155_p7, %p154_p6 }
  0x15   :  { %p157_p9 = pnand %p156_p8, %p150_p5 }
  0x17   :  { %160 = shalt.err (!%p157_p9)
}
  0x18   :  { %45 = dma.hbm_to_vmem [thread:$0]  %s226_s1, 256, %s40_s17, [#allocation7], %s188_s12, %s188_s12, %s189_s13  }
  0x19   :  { %181 = dma.done.wait [#allocation4], 256  }
  0x1a   :  { %182 = vsyncadd [#allocation4], 4294967040 }
  0x1b   :  { %183 = dma.done.wait [#allocation7], 256  }
  0x1c   :  { %184 = vsyncadd [#allocation7], 4294967040  ;;  %v66_v0 = vld [vmem:[#allocation3] sm:$0xff]  ;;  %v67_v1 = vld [vmem:[#allocation3 + $0x8] sm:$0xff]  ;;  %s191_s0 = smov [#allocation8]  }
  0x1d   :  { %v68_v2 = vld [vmem:[#allocation6] sm:$0xff]  ;;  %v69_v3 = vld [vmem:[#allocation6 + $0x8] sm:$0xff]  ;;  %s99_s21 = sshll.u32 %s191_s0, 4  ;;  %s100_s21 = int_to_ptr.vmem [resolvable:$true] %s99_s21 }
  0x1e   :  { %v70_v4 = vsub.f32 %v66_v0, %v68_v2  ;;  %v71_v5 = vsub.f32 %v67_v1, %v69_v3  ;;  %s161_s1 = scalar_lea.vmem %s100_s21, 256  ;;  %p166_p11 = scmp.lt.s32.totalorder %s100_s21, %s100_s21 }
  0x1f   :  { %p162_p10 = scmp.ne.s32.totalorder %s100_s21, %s161_s1  ;;  %p167_p12 = scmp.lt.s32.totalorder %s161_s1, %s161_s1 }
  0x20   :  { %v72_v6 = vand.u32 2147483647, %v70_v4  ;;  %v75_v7 = vmul.f32 %v70_v4, %v70_v4  ;;  %v73_v8 = vand.u32 2147483647, %v71_v5  ;;  %v76_v9 = vmul.f32 %v71_v5, %v71_v5 }
  0x21   :  { %p168_p13 = por %p167_p12, %p166_p11 }
  0x22   :  { %v74_v10 = vadd.f32 %v73_v8, %v72_v6  ;;  %v77_v11 = vadd.f32 %v76_v9, %v75_v7 }
  0x23   :  { %p169_p0 = pnand %p168_p13, %p162_p10 }
  0x24   :  { %92 = vst [vmem:[#allocation8] sm:$0xff] %v74_v10  ;;  %93 = vst [vmem:[#allocation8 + $0x8] sm:$0xff] %v77_v11 }
  0x25   :  { %172 = shalt.err (!%p169_p0)
}
  0x26   :  { %105 = dma.vmem_to_hbm [thread:$0]  %s100_s21, 256, %s227_s2, [#allocation5], %s188_s12, %s188_s12, %s189_s13  }
  0x27   :  { %185 = dma.done.wait [#allocation5], 256  }
  0x28   :  { %186 = vsyncadd [#allocation5], 4294967040 }
  0x29   :  { %109 = vsyncpa [#allocation4], 1 }
  0x2a   :  { %110 = vsyncpa [#allocation7], 1 }
  0x2b   :  { %111 = vsyncpa [#allocation5], 1 }

</bundles_post_ra>
